<compile_context>
chip_gen: v7x
topology: tpu7x:2x2x1
jax: 0.10.0
libtpu: 0.0.40
codegen_flags: <defaults>
</compile_context>

<pallas_src>
import functools

import jax
import jax.numpy as jnp
from jax.experimental import pallas as pl
from jax.experimental.pallas import tpu as pltpu

_MIB = 1024 * 1024


def _round_up(a, b):
    return -(-a // b) * b


# ---------------------------------------------------------------------------
# Kernels
# ---------------------------------------------------------------------------
def _first_argmin_lastdim(dist):
    """First-occurrence argmin along the last (lane) axis.

    Returns (min_val, argmin_idx), both shaped (rows, 1); idx is int32.
    The iota / sentinel live in f32 (exact for any realistic n_bins) so the
    lane-min reduction stays on the plain f32 path.
    """
    k = dist.shape[-1]
    min_d = jnp.min(dist, axis=-1, keepdims=True)                      # (rows, 1)
    iota = jax.lax.broadcasted_iota(jnp.int32, (1, k), 1).astype(jnp.float32)
    masked = jnp.where(dist <= min_d, iota, jnp.float32(k))            # (rows, k)
    idx = jnp.min(masked, axis=-1, keepdims=True).astype(jnp.int32)    # (rows, 1)
    return min_d, idx


def _vq_kernel(x_ref, vt_ref, hvsq_ref, o_ref):
    """Whole (padded) codebook resident in VMEM: one MXU dot + argmin."""
    scores = jnp.dot(x_ref[...], vt_ref[...], preferred_element_type=jnp.float32)
    # 0.5*||v||^2 - <x, v> has the same argmin over k as ||x - v||^2.
    _, idx = _first_argmin_lastdim(hvsq_ref[...] - scores)
    o_ref[...] = idx                                                   # (tm, 1) i32


def _vq_kernel_ktiled(x_ref, vt_ref, hvsq_ref, o_ref, min_sc, idx_sc):
    """Codebook tiled along K (trailing "arbitrary" grid axis).

    Keeps a running (min, argmin) in VMEM scratch; the x tile and output block
    stay resident across the K axis (constant index_map), so x is DMA'd from
    HBM only once per row tile.
    """
    ki = pl.program_id(1)
    tk = vt_ref.shape[-1]

    @pl.when(ki == 0)
    def _init():
        min_sc[...] = jnp.full(min_sc.shape, jnp.inf, dtype=min_sc.dtype)
        idx_sc[...] = jnp.zeros(idx_sc.shape, dtype=idx_sc.dtype)

    scores = jnp.dot(x_ref[...], vt_ref[...], preferred_element_type=jnp.float32)
    local_min, local_idx = _first_argmin_lastdim(hvsq_ref[...] - scores)
    local_idx = local_idx + ki * tk                    # global codebook index

    better = local_min < min_sc[...]                   # strict: earlier tile wins ties
    min_sc[...] = jnp.where(better, local_min, min_sc[...])
    idx_sc[...] = jnp.where(better, local_idx, idx_sc[...])

    @pl.when(ki == pl.num_programs(1) - 1)
    def _store():
        o_ref[...] = idx_sc[...]


# ---------------------------------------------------------------------------
# Tiling / wrapper
# ---------------------------------------------------------------------------
def _choose_tiles(n, d, k, x_itemsize):
    """Pick (tm, tk, k_pad): row tile, codebook tile, padded codebook size."""
    X_TARGET = 4 * _MIB      # x bytes DMA'd per grid step (perf review: 2-4 MiB)
    SLAB_BUDGET = 12 * _MIB  # ~4 live (tm, tk) f32/i32 temporaries
    TM_MAX = 8192            # (tm, 1) out/scratch blocks pad to 128 lanes (~tm*512 B)

    if n <= 1024:
        tm = n                                          # single exact row block
    else:
        tm = (X_TARGET // max(1, d * x_itemsize)) // 128 * 128
        tm = max(128, min(tm, TM_MAX))
        # Keep >= 2 row tiles so megacore sharding + DMA pipelining engage.
        tm = min(tm, _round_up(pl.cdiv(n, 2), 128))

    if 16 * tm * k <= SLAB_BUDGET:
        return tm, k, k                                 # codebook fully resident
    # Large codebook: first try shrinking tm (keeps the single-pass kernel)...
    tm_fit = (SLAB_BUDGET // (16 * k)) // 128 * 128
    if n > 1024 and tm_fit >= 1024:
        return min(tm, tm_fit), k, k
    # ...otherwise tile K with the running-argmin kernel.
    tm = min(tm, 4096)
    tk = max(128, (SLAB_BUDGET // (16 * tm)) // 128 * 128)
    return tm, tk, _round_up(k, tk)


@functools.partial(jax.jit, static_argnames=("k_tile",))
def vector_quantization(x, vectors, *, k_tile=None):
    """Pallas VectorQuantization forward: argmin_k ||x - vectors[k]||_2.

    Returns int32 indices of shape x.shape[:-1].
    `k_tile` optionally forces a codebook tile size (multiple of 128) to
    exercise the K-tiled running-argmin path; leave None in normal use.
    """
    assert x.shape[-1] == vectors.shape[-1]
    batch_shape = x.shape[:-1]
    d = x.shape[-1]
    k = vectors.shape[0]

    n = 1
    for s in batch_shape:
        n *= s
    if n == 0:
        return jnp.zeros(batch_shape, jnp.int32)

    # Keep x in its native dtype (no wrapper upcast -> no extra HBM pass of x);
    # bf16 x drives the MXU at the fast bf16 rate, accumulated in f32.
    compute_dtype = jnp.bfloat16 if x.dtype == jnp.bfloat16 else jnp.float32
    xf = x.reshape(-1, d)
    if xf.dtype != compute_dtype:
        xf = xf.astype(compute_dtype)

    # One-time codebook prep (tiny): transpose + 0.5*||v||^2 in f32.
    vf32 = vectors.astype(jnp.float32)
    half_vsq = 0.5 * jnp.sum(vf32 * vf32, axis=-1)[None, :]            # (1, K) f32
    vt = vectors.astype(compute_dtype).T                               # (D, K)

    tm, tk, k_pad = _choose_tiles(n, d, k, xf.dtype.itemsize)
    if k_tile is not None:                  # test / override hook
        tk = max(128, (int(k_tile) // 128) * 128)
        k_pad = _round_up(k, tk)

    if k_pad > k:
        # Pad codebook: zero columns with +inf bias -> dist = +inf, never selected.
        vt = jnp.pad(vt, ((0, 0), (0, k_pad - k)))
        half_vsq = jnp.pad(half_vsq, ((0, 0), (0, k_pad - k)),
                           constant_values=jnp.inf)

    num_row_tiles = pl.cdiv(n, tm)
    num_k_tiles = k_pad // tk
    n_out = num_row_tiles * tm

    if num_k_tiles == 1:
        kernel = _vq_kernel
        grid = (num_row_tiles,)
        in_specs = [
            pl.BlockSpec((tm, d), lambda i: (i, 0)),        # tile of x rows
            pl.BlockSpec((d, k_pad), lambda i: (0, 0)),     # resident codebook^T
            pl.BlockSpec((1, k_pad), lambda i: (0, 0)),     # resident 0.5*||v||^2
        ]
        out_specs = pl.BlockSpec((tm, 1), lambda i: (i, 0))
        scratch_shapes = []
        dims = ("parallel",)
    else:
        kernel = _vq_kernel_ktiled
        grid = (num_row_tiles, num_k_tiles)                 # reduction axis last
        in_specs = [
            pl.BlockSpec((tm, d), lambda i, j: (i, 0)),     # x resident across K
            pl.BlockSpec((d, tk), lambda i, j: (0, j)),
            pl.BlockSpec((1, tk), lambda i, j: (0, j)),
        ]
        out_specs = pl.BlockSpec((tm, 1), lambda i, j: (i, 0))
        scratch_shapes = [pltpu.VMEM((tm, 1), jnp.float32),
                          pltpu.VMEM((tm, 1), jnp.int32)]
        dims = ("parallel", "arbitrary")

    # Explicit VMEM budget: v7x has 64 MiB physical; v5e's scoped default is
    # only 16 MiB, so raise the limit to what this kernel actually needs.
    est = (2 * tm * d * xf.dtype.itemsize          # double-buffered x tiles
           + 2 * d * tk * vt.dtype.itemsize        # codebook tiles
           + 2 * 8 * tk * 4                        # 0.5||v||^2 tiles (sublane pad)
           + 4 * tm * tk * 4                       # (tm, tk) f32/i32 temporaries
           + (2 + 2 * (num_k_tiles > 1)) * tm * 512)  # lane-padded out/scratch
    vmem_limit = int(min(max(32 * _MIB, est + 4 * _MIB), 56 * _MIB))

    out = pl.pallas_call(
        kernel,
        out_shape=jax.ShapeDtypeStruct((n_out, 1), jnp.int32),
        grid_spec=pltpu.PrefetchScalarGridSpec(
            num_scalar_prefetch=0,
            grid=grid,
            in_specs=in_specs,
            out_specs=out_specs,
            scratch_shapes=scratch_shapes,
        ),
        compiler_params=pltpu.CompilerParams(
            dimension_semantics=dims,
            vmem_limit_bytes=vmem_limit,
        ),
    )(xf, vt, half_vsq)

    # Garbage rows of the ragged last block land past n and are sliced off.
    return out[:n, 0].reshape(batch_shape)


def make_codebook(key, n_bins, input_dim):
    """Deterministic init matching vectors.uniform_(-1/n_bins, 1/n_bins)."""
    lo, hi = -1.0 / n_bins, 1.0 / n_bins
    return jax.random.uniform(
        key, (n_bins, input_dim), dtype=jnp.float32, minval=lo, maxval=hi
    )


# ---------------------------------------------------------------------------
# Reference / checks
# ---------------------------------------------------------------------------
def _reference_indices(x, vectors):
    xf = x.astype(jnp.float32)
    vf = vectors.astype(jnp.float32)
    d2 = jnp.sum((xf[..., None, :] - vf) ** 2, axis=-1)
    return jnp.argmin(d2, axis=-1).astype(jnp.int32)


def _check_near_optimal(idx, x, vectors, tol):
    """Chosen codeword's squared distance is within `tol` of the true minimum."""
    xf = x.astype(jnp.float32).reshape(-1, x.shape[-1])
    vf = vectors.astype(jnp.float32)
    d2 = jnp.sum((xf[:, None, :] - vf[None, :, :]) ** 2, axis=-1)      # (N, K)
    chosen = jnp.take_along_axis(d2, idx.reshape(-1, 1).astype(jnp.int32), axis=-1)[:, 0]
    best = jnp.min(d2, axis=-1)
    assert bool(jnp.all(chosen <= best + tol)), "quantization index not near-optimal"


if __name__ == "__main__":
    input_dim = 32
    n_bins = 16

    key = jax.random.PRNGKey(0)
    k_vec, k_x, k_vec2, k_x2 = jax.random.split(key, 4)

    # --- 1) small f32 input, resident codebook (matches PyTorch defaults) ----
    vectors = make_codebook(k_vec, n_bins, input_dim)
    x = jax.random.normal(k_x, (2, 8, input_dim), dtype=jnp.float32) * 0.1

    indices = vector_quantization(x, vectors)
    jax.block_until_ready(indices)
    assert indices.shape == x.shape[:-1] and indices.dtype == jnp.int32
    ref = _reference_indices(x, vectors)
    if not jnp.array_equal(indices, ref):
        # Only near-exact ties at f32 rounding scale may legitimately differ.
        _check_near_optimal(indices, x, vectors, tol=1e-6)

    # --- 2) bf16 input path (no wrapper upcast, bf16 MXU) --------------------
    xb = x.astype(jnp.bfloat16)
    idx_b = vector_quantization(xb, vectors)
    jax.block_until_ready(idx_b)
    assert idx_b.shape == x.shape[:-1]
    _check_near_optimal(idx_b, xb, vectors, tol=1e-2)

    # --- 3) multi row tiles (ragged last block) + K-tiled running-argmin -----
    vectors2 = jax.random.normal(k_vec2, (300, input_dim), dtype=jnp.float32) * 0.1
    x2 = jax.random.normal(k_x2, (1100, input_dim), dtype=jnp.float32) * 0.1
    idx2 = vector_quantization(x2, vectors2, k_tile=128)
    jax.block_until_ready(idx2)
    assert idx2.shape == (1100,)
    _check_near_optimal(idx2, x2, vectors2, tol=1e-5)

    print("KERNEL_OK")
</pallas_src>

<mosaic_0001>
module attributes {stable_mosaic.version = 11 : i64} {
  func.func @_vq_kernel(%arg0: i32, %arg1: memref<16x32xf32, #tpu.memory_space<vmem>>, %arg2: memref<32x16xf32, #tpu.memory_space<vmem>>, %arg3: memref<1x16xf32, #tpu.memory_space<vmem>>, %arg4: memref<16x1xi32, #tpu.memory_space<vmem>>) attributes {dimension_semantics = [#tpu.dimension_semantics<parallel>], iteration_bounds = array<i64: 1>, scalar_prefetch = 0 : i64, scratch_operands = 0 : i64, tpu.core_type = #tpu.core_type<tc>, window_params = [{transform_indices = @transform_0, window_bounds = array<i64: 16, 32>}, {pipeline_mode = #tpu.pipeline_mode<synchronous>, transform_indices = @transform_1, window_bounds = array<i64: 32, 16>}, {pipeline_mode = #tpu.pipeline_mode<synchronous>, transform_indices = @transform_2, window_bounds = array<i64: 1, 16>}, {transform_indices = @transform_3, window_bounds = array<i64: 16, 1>}]} {
    %c0 = arith.constant 0 : index
    %c0_0 = arith.constant 0 : index
    %0 = vector.load %arg1[%c0, %c0_0] : memref<16x32xf32, #tpu.memory_space<vmem>>, vector<16x32xf32>
    %c0_1 = arith.constant 0 : index
    %c0_2 = arith.constant 0 : index
    %1 = vector.load %arg2[%c0_1, %c0_2] : memref<32x16xf32, #tpu.memory_space<vmem>>, vector<32x16xf32>
    %cst = arith.constant dense<0.000000e+00> : vector<16x16xf32>
    %2 = tpu.matmul %0, %1, %cst {dimension_numbers = #tpu.dot_dimension_numbers<[1], [0], [0], [1], [0, 0, 1, 1], [], []>} : vector<16x32xf32>, vector<32x16xf32>, vector<16x16xf32> -> vector<16x16xf32>
    %c0_3 = arith.constant 0 : index
    %c0_4 = arith.constant 0 : index
    %3 = vector.load %arg3[%c0_3, %c0_4] : memref<1x16xf32, #tpu.memory_space<vmem>>, vector<1x16xf32>
    %4 = vector.broadcast %3 : vector<1x16xf32> to vector<16x16xf32>
    %5 = arith.subf %4, %2 : vector<16x16xf32>
    %cst_5 = arith.constant dense<0x7F800000> : vector<16xf32>
    %6 = vector.multi_reduction <minimumf>, %5, %cst_5 [1] : vector<16x16xf32> to vector<16xf32>
    %7 = vector.shape_cast %6 : vector<16xf32> to vector<16x1xf32>
    %8 = tpu.iota {dimensions = array<i32: 1>} : vector<1x16xi32>
    %9 = arith.sitofp %8 : vector<1x16xi32> to vector<1x16xf32>
    %10 = vector.broadcast %7 : vector<16x1xf32> to vector<16x16xf32>
    %11 = arith.cmpf ole, %5, %10 : vector<16x16xf32>
    %cst_6 = arith.constant 1.600000e+01 : f32
    %12 = vector.shape_cast %9 : vector<1x16xf32> to vector<1x16xf32>
    %13 = vector.broadcast %12 : vector<1x16xf32> to vector<16x16xf32>
    %14 = vector.broadcast %cst_6 : f32 to vector<16x16xf32>
    %15 = arith.select %11, %13, %14 : vector<16x16xi1>, vector<16x16xf32>
    %cst_7 = arith.constant dense<0x7F800000> : vector<16xf32>
    %16 = vector.multi_reduction <minimumf>, %15, %cst_7 [1] : vector<16x16xf32> to vector<16xf32>
    %17 = vector.shape_cast %16 : vector<16xf32> to vector<16x1xf32>
    %18 = arith.fptosi %17 : vector<16x1xf32> to vector<16x1xi32>
    %c0_8 = arith.constant 0 : index
    %c0_9 = arith.constant 0 : index
    %19 = vector.load %arg4[%c0_8, %c0_9] : memref<16x1xi32, #tpu.memory_space<vmem>>, vector<16x1xi32>
    tpu.vector_store %arg4[%c0_8, %c0_9], %18 {strides = array<i32>} : memref<16x1xi32, #tpu.memory_space<vmem>>, vector<16x1xi32>,
    return
  }
  func.func @transform_0(%arg0: i32) -> (i32, i32) {
    %c0_i32 = arith.constant 0 : i32
    %c0_i32_0 = arith.constant 0 : i32
    return %arg0, %c0_i32 : i32, i32
  }
  func.func @transform_1(%arg0: i32) -> (i32, i32) {
    %c0_i32 = arith.constant 0 : i32
    %c0_i32_0 = arith.constant 0 : i32
    %c0_i32_1 = arith.constant 0 : i32
    return %c0_i32, %c0_i32_0 : i32, i32
  }
  func.func @transform_2(%arg0: i32) -> (i32, i32) {
    %c0_i32 = arith.constant 0 : i32
    %c0_i32_0 = arith.constant 0 : i32
    %c0_i32_1 = arith.constant 0 : i32
    return %c0_i32, %c0_i32_0 : i32, i32
  }
  func.func @transform_3(%arg0: i32) -> (i32, i32) {
    %c0_i32 = arith.constant 0 : i32
    %c0_i32_0 = arith.constant 0 : i32
    return %arg0, %c0_i32 : i32, i32
  }
}

</mosaic_0001>

<bundles_post_ra>
// kernel: squeeze.1
= control target key start
LH: loop header
LB: loop body
LE: loop exit
PB: predicated region body
PF: predicated region fallthrough
CT: control target
= control target key end

     0   :  { %s85_s0 = inlined_call_operand.vmem [shape: s32[16], index: 0, kind: input, shape index: {}]   ;;  %s86_s1 = inlined_call_operand.hbm [shape: s32[2,8], index: 1, kind: output, shape index: {}]  }
   0x1   :  { %v5_v0 = vld [vmem:[%s85_s0] sm:$0x1] }
   0x2   :  { %2 = vsyncpa [#allocation1], 0  ;;  %6 = vst [vmem:[#allocation3] sm:$0x1] %v5_v0  ;;  %vm8_vm0 = vcmask 64512   ;;  %s58_s0 = smov 120  }
   0x3   :  { %s59_s8 = smov [#allocation0]  }
   0x4   :  { %s26_s9 = sshll.u32 %s59_s8, 4  ;;  %s27_s9 = int_to_ptr.vmem [resolvable:$true] %s26_s9 }
   0x5   :  { %s34_s10 = scalar_lea.vmem %s27_s9, 32  ;;  %p39_p1 = scmp.lt.s32.totalorder %s27_s9, %s27_s9 }
   0x6   :  { %p35_p0 = scmp.ne.s32.totalorder %s27_s9, %s34_s10  ;;  %p40_p2 = scmp.lt.s32.totalorder %s34_s10, %s34_s10 }
   0x8   :  { %p41_p3 = por %p40_p2, %p39_p1 }
   0x9   :  { %v10_v1 = vld [vmem:[#allocation3] sm:$0x1]  }
   0xa   :  { %v7_v2 = vld [vmem:[#allocation3] sm:$0x1]   ;;  %11 = vrot.lane.b32.xlu0 %v10_v1, %s58_s0  ;;  %p42_p4 = pnand %p41_p3, %p35_p0 }
   0xb   :  { %9 = vst.msk [vmem:[#allocation2] sm:$0x1] %vm8_vm0, %v7_v2  }
  0x7c   :  { %v12_v3 = vpop.permute.xlu0 %11  }
  0x7d   :  { %15 = vst.msk [vmem:[#allocation2 + $0x1] sm:$0x1] %vm8_vm0, %v12_v3  }
  0x84   :  { %v19_v4 = vld [vmem:[#allocation2] sm:$0x3] }
  0x85   :  { %21 = vst [vmem:[#allocation0] sm:$0x3] %v19_v4 }
  0x86   :  { %45 = shalt.err (!%p42_p4)
}
  0x87   :  { %s46_s13 = scalar_lea.hbm %s86_s1, 32 }
  0x88   :  { %p47_p5 = scmp.ne.s32.totalorder %s86_s1, %s46_s13  ;;  %p50_p6 = scmp.lt.u32.totalorder %s46_s13, %s86_s1 }
  0x8a   :  { %p52_p7 = pnand %p50_p6, %p47_p5 }
  0x8c   :  { %55 = shalt.err (!%p52_p7)
}
  0x8d   :  { %29 = dma.vmem_to_hbm [thread:$0]  %s27_s9, 32, %s86_s1, [#allocation1]  }
  0x8e   :  { %56 = dma.done.wait [#allocation1], 32  }
  0x8f   :  { %57 = vsyncadd [#allocation1], 4294967264 }
  0x90   :  { %31 = vsyncpa [#allocation1], 1 }

// kernel: vector_quantization.1
= control target key start
LH: loop header
LB: loop body
LE: loop exit
PB: predicated region body
PF: predicated region fallthrough
CT: control target
= control target key end

     0   :  { %vm20_vm0 = vcmask 261120   ;;  %vm111_vm1 = vcmask 130048   ;;  %v118_v15 = vlaneseq  ;;  %vm133_vm4 = vcmask 7168   ;;  %s223_s1 = inlined_call_operand.vmem [shape: f32[32,16], index: 1, kind: input, shape index: {}]   ;;  %s224_s0 = inlined_call_operand.vmem [shape: f32[16,32], index: 0, kind: input, shape index: {}]   ;;  %s225_s2 = inlined_call_operand.vmem [shape: f32[1,16], index: 2, kind: input, shape index: {}]   ;;  %s226_s3 = inlined_call_operand.vmem [shape: s32[16,1], index: 3, kind: output, shape index: {}]  }
   0x1   :  { %v16_v0 = vld [vmem:[%s223_s1] sm:$0xff]  ;;  %v17_v1 = vld [vmem:[%s223_s1 + $0x8] sm:$0xff]  ;;  %v18_v2 = vld [vmem:[%s223_s1 + $0x10] sm:$0xff] }
   0x2   :  { %v160_v3 = vpack.c.bf16 %v17_v1, %v16_v0  ;;  %v19_v4 = vld [vmem:[%s223_s1 + $0x18] sm:$0xff]  ;;  %v14_v5 = vld [vmem:[%s224_s0] sm:$0xff]  ;;  %v15_v7 = vld [vmem:[%s224_s0 + $0x8] sm:$0xff]  ;;  %v119_v16 = vand.u32 127, %v118_v15 }
   0x3   :  { %v164_v6 = vpack.c.bf16 %v19_v4, %v18_v2  ;;  %157 = vmatprep.mubr.msk.f32.mxu0 %vm20_vm0, %v14_v5  ;;  %v142_v8 = vld [vmem:[%s225_s2] ss:$0 sm:$0xff] }
   0x4   :  { %161 = vmatprep.subr.bf16.mxu0 %v160_v3  ;;  %v120_v17 = vcvt.s32.f32 %v119_v16 }
   0x5   :  { %163 = vmatpush3.bf16.msra.mxu0 %v160_v3 }
   0x6   :  { %165 = vmatprep.subr.bf16.mxu0 %v164_v6 }
   0x9   :  { %167 = vmatpush3.bf16.msra.mxu0 %v164_v6 }
   0xc   :  { %158 = vmatmul.mubr.msk.f32.vlgmr.msra.gmra.mrb[0].mxu0 %vm20_vm0, %v15_v7 }
  0xdf   :  { %v159_v9 = vpop.f32.mrb[0].mxu0 }
  0xe0   :  { %v93_v10 = vpop.f32.mrb[1].mxu0  ;;  %v110_v12 = vsub.f32 %v142_v8, %v159_v9 }
  0xe1   :  { %v109_v11 = vsub.f32 %v142_v8, %v93_v10 }
  0xe2   :  { %v115_v14 = vsel %vm111_vm1, %v110_v12, inf }
  0xe3   :  { %v112_v13 = vsel %vm111_vm1, %v109_v11, inf }
  0xe4   :  { %113 = vmin.xlane.f32.xlu0 %v112_v13 }
  0xe8   :  { %116 = vmin.xlane.f32.xlu0 %v115_v14 }
 0x171   :  { %v114_v18 = vpop.xlane.xlu0 %113 }
 0x172   :  { %vm121_vm2 = vcmp.le.f32.partialorder %v109_v11, %v114_v18 }
 0x173   :  { %v123_v19 = vsel %vm121_vm2, %v120_v17, 16.0 }
 0x174   :  { %v125_v20 = vsel %vm111_vm1, %v123_v19, inf }
 0x175   :  { %126 = vmin.xlane.f32.xlu1 %v125_v20  ;;  %v117_v21 = vpop.xlane.xlu0 %116 }
 0x176   :  { %vm122_vm3 = vcmp.le.f32.partialorder %v110_v12, %v117_v21 }
 0x177   :  { %v124_v22 = vsel %vm122_vm3, %v120_v17, 16.0 }
 0x178   :  { %v128_v23 = vsel %vm111_vm1, %v124_v22, inf }
 0x179   :  { %129 = vmin.xlane.f32.xlu1 %v128_v23 }
 0x202   :  { %v127_v24 = vpop.xlane.xlu1 %126 }
 0x203   :  { %v168_v25 = vtrunc.f32 %v127_v24 }
 0x205   :  { %v169_v26 = vcvt.f32.s32 %v168_v25 }
 0x206   :  { %v130_v27 = vpop.xlane.xlu1 %129 }
 0x207   :  { %134 = vst.msk [vmem:[%s226_s3] sm:$0xff] %vm133_vm4, %v169_v26  ;;  %v170_v28 = vtrunc.f32 %v130_v27 }
 0x209   :  { %v171_v29 = vcvt.f32.s32 %v170_v28 }
 0x20b   :  { %135 = vst.msk [vmem:[%s226_s3 + $0x8] sm:$0xff] %vm133_vm4, %v171_v29 }

</bundles_post_ra>
